<compile_context>
chip_gen: v7x
topology: tpu7x:2x2x1
jax: 0.10.0
libtpu: 0.0.40
codegen_flags: <defaults>
</compile_context>

<pallas_src>
import functools

import jax
import jax.numpy as jnp
from jax.experimental import pallas as pl
from jax.experimental.pallas import tpu as pltpu


def _dense_synth_kernel(xh_ref, xv_ref, w1t_ref, b1_ref, w2t_ref, b2_ref,
                        wvt_ref, bv_ref, b_out_ref, v_out_ref):
    # V projection: one (block_m, D) @ (D, D) MXU matmul; f32 accumulate + f32 epilogue.
    v = jnp.dot(xv_ref[...], wvt_ref[...], preferred_element_type=jnp.float32)
    v_out_ref[...] = (v + bv_ref[...]).astype(v_out_ref.dtype)

    # Synthetic attention logits B: heads folded into the M dimension, so both MLP
    # matmuls are a single large-M MXU pass each (no per-head loop, no sub-128-lane
    # slicing of the activations). Bias add + ReLU stay in f32 on the VPU.
    hid = jnp.dot(xh_ref[...], w1t_ref[...], preferred_element_type=jnp.float32)
    hid = jnp.maximum(hid + b1_ref[...], 0.0)
    b = jnp.dot(hid.astype(w2t_ref.dtype), w2t_ref[...],
                preferred_element_type=jnp.float32)
    # Lane-dense store: a (block_m*H, seq_length) slab; head split / permute is done
    # by XLA in the wrapper.
    b_out_ref[...] = (b + b2_ref[...]).astype(b_out_ref.dtype)


def _build_pallas_call(*, m_pad, block_m, d_model, n_head, dh, seq_length,
                       compute_dtype, single_buffer_weights):
    num_blocks = m_pad // block_m
    bh = block_m * n_head

    if single_buffer_weights and hasattr(pl, "Buffered"):
        def wspec(shape):
            # Weights/biases are grid-invariant; single-buffer them to halve their
            # VMEM footprint (important on v7x's 64 MiB VMEM for large d_model).
            return pl.BlockSpec(shape, lambda i: (0, 0), pipeline_mode=pl.Buffered(1))
    else:
        def wspec(shape):
            return pl.BlockSpec(shape, lambda i: (0, 0))

    in_specs = [
        pl.BlockSpec((bh, dh), lambda i: (i, 0)),            # emb rows, heads folded in
        pl.BlockSpec((block_m, d_model), lambda i: (i, 0)),  # V-projection input rows
        wspec((dh, dh)), wspec((1, dh)),                     # W1^T, b1
        wspec((dh, seq_length)), wspec((1, seq_length)),     # W2^T, b2
        wspec((d_model, d_model)), wspec((1, d_model)),      # V^T,  bV
    ]
    out_specs = (
        pl.BlockSpec((bh, seq_length), lambda i: (i, 0)),    # B slab (M*H, seq_length)
        pl.BlockSpec((block_m, d_model), lambda i: (i, 0)),  # v slab (M, D)
    )
    out_shapes = (
        jax.ShapeDtypeStruct((m_pad * n_head, seq_length), jnp.float32),
        jax.ShapeDtypeStruct((m_pad, d_model), jnp.float32),
    )

    itemsize = jnp.dtype(compute_dtype).itemsize
    flops = (2 * m_pad * d_model * d_model
             + 2 * m_pad * n_head * dh * (dh + seq_length))
    bytes_accessed = (
        (m_pad * n_head * dh + m_pad * d_model) * itemsize            # activations in
        + (dh * dh + dh * seq_length + d_model * d_model) * itemsize  # weights
        + (dh + seq_length + d_model) * 4                             # biases (f32)
        + (m_pad * n_head * seq_length + m_pad * d_model) * 4)        # outputs (f32)

    # Per-step VMEM: double-buffered activation/output blocks + weight blocks
    # (conservatively counted double-buffered), with 2x headroom; clamp to the
    # smallest physical VMEM across chips (v7x: 64 MiB).
    act_bytes = 2 * (bh * dh + block_m * d_model) * itemsize
    out_bytes = 2 * (bh * seq_length + block_m * d_model) * 4
    wgt_bytes = 2 * ((dh * dh + dh * seq_length + d_model * d_model) * itemsize
                     + (dh + seq_length + d_model) * 4)
    vmem_limit = 2 * (act_bytes + out_bytes + wgt_bytes)
    vmem_limit = int(min(max(vmem_limit, 16 * 1024 * 1024), 64 * 1024 * 1024))

    return pl.pallas_call(
        _dense_synth_kernel,
        out_shape=out_shapes,
        grid_spec=pltpu.PrefetchScalarGridSpec(
            num_scalar_prefetch=0,
            grid=(num_blocks,),
            in_specs=in_specs,
            out_specs=out_specs,
        ),
        compiler_params=pltpu.CompilerParams(
            dimension_semantics=("parallel",),
            vmem_limit_bytes=vmem_limit,
        ),
        cost_estimate=pl.CostEstimate(
            flops=int(flops), transcendentals=0, bytes_accessed=int(bytes_accessed)),
    )


def dense_synthesizer_forward(emb, params, *, n_head, seq_length, enc_inputs=None,
                              block_m=None, compute_dtype=jnp.bfloat16):
    """emb: (batch, seq_len, d_model) f32.  Returns (B, v) in the PyTorch layout:
       B: (batch, n_head, seq_len, seq_length), v: (batch, n_head, seq_len, d_model//n_head)."""
    batch, seq_len, d_model = emb.shape
    assert d_model % n_head == 0
    dh = d_model // n_head

    # TODO(synk): enc_inputs with a different (batch, seq_len) than emb would need its own
    # row grid; only the same-shape case is fused here (the PyTorch default path is None).
    v_src = emb if enc_inputs is None else enc_inputs
    assert v_src.shape == emb.shape

    M = batch * seq_len
    if block_m is None:
        # Fold batch+seq into the row dim; 256-row tiles fill the 256x256 MXU (v6e/v7x),
        # a single grid step when the whole problem is small.
        block_m = M if M <= 256 else 256
    num_blocks = pl.cdiv(M, block_m)
    m_pad = num_blocks * block_m

    xb = emb.reshape(M, d_model)
    xv = v_src.reshape(M, d_model)
    if m_pad != M:
        xb = jnp.pad(xb, ((0, m_pad - M), (0, 0)))
        xv = jnp.pad(xv, ((0, m_pad - M), (0, 0)))
    # Heads folded into rows for the W1/W2 MLP (free reshape: head dim is innermost).
    xh = xb.reshape(m_pad * n_head, dh).astype(compute_dtype)
    xv = xv.astype(compute_dtype)

    # nn.Linear stores weight as (out, in); pre-transpose to (in, out) so kernel does x @ W^T.
    # Weights in bf16 (MXU), biases kept in f32 (VPU epilogue).
    w1t = params["W1_w"].T.astype(compute_dtype)
    w2t = params["W2_w"].T.astype(compute_dtype)
    wvt = params["V_w"].T.astype(compute_dtype)
    b1 = params["W1_b"].reshape(1, dh).astype(jnp.float32)
    b2 = params["W2_b"].reshape(1, seq_length).astype(jnp.float32)
    bv = params["V_b"].reshape(1, d_model).astype(jnp.float32)

    operands = (xh, xv, w1t, b1, w2t, b2, wvt, bv)
    build = functools.partial(
        _build_pallas_call, m_pad=m_pad, block_m=block_m, d_model=d_model,
        n_head=n_head, dh=dh, seq_length=seq_length, compute_dtype=compute_dtype)
    try:
        b_flat, v_flat = build(single_buffer_weights=True)(*operands)
        # Block here so both lowering- and run-time rejections of the single-buffer
        # hint are caught and we fall back to default double buffering.
        b_flat, v_flat = jax.block_until_ready((b_flat, v_flat))
    except Exception:
        b_flat, v_flat = build(single_buffer_weights=False)(*operands)

    # Un-pad and apply the PyTorch permutes in XLA (stores in-kernel were lane-dense slabs).
    b_flat = b_flat[: M * n_head]
    v_flat = v_flat[:M]
    B = b_flat.reshape(batch, seq_len, n_head, seq_length).transpose(0, 2, 1, 3)
    v = v_flat.reshape(batch, seq_len, n_head, dh).transpose(0, 2, 1, 3)
    return B, v


def _reference_forward(emb, params, *, n_head, seq_length, enc_inputs=None,
                       compute_dtype=jnp.bfloat16):
    """Pure-JAX reference mirroring the kernel numerics (bf16 weights/activations,
    f32 accumulation, f32 bias/ReLU)."""
    batch, seq_len, d_model = emb.shape
    dh = d_model // n_head
    q = lambda a: a.astype(compute_dtype).astype(jnp.float32)
    head_div = q(emb).reshape(batch, seq_len, n_head, dh)
    hid = jnp.maximum(head_div @ q(params["W1_w"].T) + params["W1_b"], 0.0)
    B = (q(hid) @ q(params["W2_w"].T) + params["W2_b"]).transpose(0, 2, 1, 3)
    v_src = q(emb if enc_inputs is None else enc_inputs)
    v = (v_src @ q(params["V_w"].T) + params["V_b"]).reshape(batch, seq_len, n_head, dh)
    return B, v.transpose(0, 2, 1, 3)


def make_params(key, d_model, n_head, seq_length):
    dh = d_model // n_head
    k1, k2, k3, k4, k5, k6 = jax.random.split(key, 6)
    scale1 = 1.0 / jnp.sqrt(dh)
    scalev = 1.0 / jnp.sqrt(d_model)
    return {
        "W1_w": jax.random.uniform(k1, (dh, dh), jnp.float32, -scale1, scale1),
        "W1_b": jax.random.uniform(k2, (dh,), jnp.float32, -scale1, scale1),
        "W2_w": jax.random.uniform(k3, (seq_length, dh), jnp.float32, -scale1, scale1),
        "W2_b": jax.random.uniform(k4, (seq_length,), jnp.float32, -scale1, scale1),
        "V_w": jax.random.uniform(k5, (d_model, d_model), jnp.float32, -scalev, scalev),
        "V_b": jax.random.uniform(k6, (d_model,), jnp.float32, -scalev, scalev),
    }


if __name__ == "__main__":
    d_model, n_head, seq_length = 32, 4, 8
    batch, seq_len = 2, 8

    key = jax.random.PRNGKey(0)
    kp, kx = jax.random.split(key)
    params = make_params(kp, d_model, n_head, seq_length)
    emb = jax.random.normal(kx, (batch, seq_len, d_model), jnp.float32)

    B_out, v_out = dense_synthesizer_forward(
        emb, params, n_head=n_head, seq_length=seq_length)
    B_out = jax.block_until_ready(B_out)
    v_out = jax.block_until_ready(v_out)

    B_ref, v_ref = _reference_forward(
        emb, params, n_head=n_head, seq_length=seq_length)
    assert B_out.shape == (batch, n_head, seq_len, seq_length)
    assert v_out.shape == (batch, n_head, seq_len, d_model // n_head)
    assert jnp.allclose(B_out, B_ref, atol=1e-3, rtol=1e-3), \
        float(jnp.max(jnp.abs(B_out - B_ref)))
    assert jnp.allclose(v_out, v_ref, atol=1e-3, rtol=1e-3), \
        float(jnp.max(jnp.abs(v_out - v_ref)))

    print("KERNEL_OK")
</pallas_src>

<mosaic_0001>
module attributes {stable_mosaic.version = 11 : i64} {
  func.func @_dense_synth_kernel(%arg0: i32, %arg1: memref<64x8xbf16, #tpu.memory_space<vmem>>, %arg2: memref<16x32xbf16, #tpu.memory_space<vmem>>, %arg3: memref<8x8xbf16, #tpu.memory_space<vmem>>, %arg4: memref<1x8xf32, #tpu.memory_space<vmem>>, %arg5: memref<8x8xbf16, #tpu.memory_space<vmem>>, %arg6: memref<1x8xf32, #tpu.memory_space<vmem>>, %arg7: memref<32x32xbf16, #tpu.memory_space<vmem>>, %arg8: memref<1x32xf32, #tpu.memory_space<vmem>>, %arg9: memref<64x8xf32, #tpu.memory_space<vmem>>, %arg10: memref<16x32xf32, #tpu.memory_space<vmem>>) attributes {dimension_semantics = [#tpu.dimension_semantics<parallel>], iteration_bounds = array<i64: 1>, scalar_prefetch = 0 : i64, scratch_operands = 0 : i64, tpu.core_type = #tpu.core_type<tc>, window_params = [{transform_indices = @transform_0, window_bounds = array<i64: 64, 8>}, {transform_indices = @transform_1, window_bounds = array<i64: 16, 32>}, {pipeline_mode = #tpu.pipeline_mode<synchronous>, transform_indices = @transform_2, window_bounds = array<i64: 8, 8>}, {pipeline_mode = #tpu.pipeline_mode<synchronous>, transform_indices = @transform_3, window_bounds = array<i64: 1, 8>}, {pipeline_mode = #tpu.pipeline_mode<synchronous>, transform_indices = @transform_4, window_bounds = array<i64: 8, 8>}, {pipeline_mode = #tpu.pipeline_mode<synchronous>, transform_indices = @transform_5, window_bounds = array<i64: 1, 8>}, {pipeline_mode = #tpu.pipeline_mode<synchronous>, transform_indices = @transform_6, window_bounds = array<i64: 32, 32>}, {pipeline_mode = #tpu.pipeline_mode<synchronous>, transform_indices = @transform_7, window_bounds = array<i64: 1, 32>}, {transform_indices = @transform_8, window_bounds = array<i64: 64, 8>}, {transform_indices = @transform_9, window_bounds = array<i64: 16, 32>}]} {
    %c0 = arith.constant 0 : index
    %c0_0 = arith.constant 0 : index
    %0 = vector.load %arg2[%c0, %c0_0] : memref<16x32xbf16, #tpu.memory_space<vmem>>, vector<16x32xbf16>
    %c0_1 = arith.constant 0 : index
    %c0_2 = arith.constant 0 : index
    %1 = vector.load %arg7[%c0_1, %c0_2] : memref<32x32xbf16, #tpu.memory_space<vmem>>, vector<32x32xbf16>
    %cst = arith.constant dense<0.000000e+00> : vector<16x32xf32>
    %2 = tpu.matmul %0, %1, %cst {dimension_numbers = #tpu.dot_dimension_numbers<[1], [0], [0], [1], [0, 0, 1, 1], [], []>} : vector<16x32xbf16>, vector<32x32xbf16>, vector<16x32xf32> -> vector<16x32xf32>
    %c0_3 = arith.constant 0 : index
    %c0_4 = arith.constant 0 : index
    %3 = vector.load %arg8[%c0_3, %c0_4] : memref<1x32xf32, #tpu.memory_space<vmem>>, vector<1x32xf32>
    %4 = vector.broadcast %3 : vector<1x32xf32> to vector<16x32xf32>
    %5 = arith.addf %2, %4 : vector<16x32xf32>
    %c0_5 = arith.constant 0 : index
    %c0_6 = arith.constant 0 : index
    %6 = vector.load %arg10[%c0_5, %c0_6] : memref<16x32xf32, #tpu.memory_space<vmem>>, vector<16x32xf32>
    tpu.vector_store %arg10[%c0_5, %c0_6], %5 {strides = array<i32>} : memref<16x32xf32, #tpu.memory_space<vmem>>, vector<16x32xf32>,
    %c0_7 = arith.constant 0 : index
    %c0_8 = arith.constant 0 : index
    %7 = vector.load %arg1[%c0_7, %c0_8] : memref<64x8xbf16, #tpu.memory_space<vmem>>, vector<64x8xbf16>
    %c0_9 = arith.constant 0 : index
    %c0_10 = arith.constant 0 : index
    %8 = vector.load %arg3[%c0_9, %c0_10] : memref<8x8xbf16, #tpu.memory_space<vmem>>, vector<8x8xbf16>
    %cst_11 = arith.constant dense<0.000000e+00> : vector<64x8xf32>
    %9 = tpu.matmul %7, %8, %cst_11 {dimension_numbers = #tpu.dot_dimension_numbers<[1], [0], [0], [1], [0, 0, 1, 1], [], []>} : vector<64x8xbf16>, vector<8x8xbf16>, vector<64x8xf32> -> vector<64x8xf32>
    %c0_12 = arith.constant 0 : index
    %c0_13 = arith.constant 0 : index
    %10 = vector.load %arg4[%c0_12, %c0_13] : memref<1x8xf32, #tpu.memory_space<vmem>>, vector<1x8xf32>
    %11 = vector.broadcast %10 : vector<1x8xf32> to vector<64x8xf32>
    %12 = arith.addf %9, %11 : vector<64x8xf32>
    %cst_14 = arith.constant 0.000000e+00 : f32
    %13 = vector.broadcast %cst_14 : f32 to vector<64x8xf32>
    %14 = arith.maximumf %12, %13 : vector<64x8xf32>
    %15 = arith.truncf %14 : vector<64x8xf32> to vector<64x8xbf16>
    %c0_15 = arith.constant 0 : index
    %c0_16 = arith.constant 0 : index
    %16 = vector.load %arg5[%c0_15, %c0_16] : memref<8x8xbf16, #tpu.memory_space<vmem>>, vector<8x8xbf16>
    %cst_17 = arith.constant dense<0.000000e+00> : vector<64x8xf32>
    %17 = tpu.matmul %15, %16, %cst_17 {dimension_numbers = #tpu.dot_dimension_numbers<[1], [0], [0], [1], [0, 0, 1, 1], [], []>} : vector<64x8xbf16>, vector<8x8xbf16>, vector<64x8xf32> -> vector<64x8xf32>
    %c0_18 = arith.constant 0 : index
    %c0_19 = arith.constant 0 : index
    %18 = vector.load %arg6[%c0_18, %c0_19] : memref<1x8xf32, #tpu.memory_space<vmem>>, vector<1x8xf32>
    %19 = vector.broadcast %18 : vector<1x8xf32> to vector<64x8xf32>
    %20 = arith.addf %17, %19 : vector<64x8xf32>
    %c0_20 = arith.constant 0 : index
    %c0_21 = arith.constant 0 : index
    %21 = vector.load %arg9[%c0_20, %c0_21] : memref<64x8xf32, #tpu.memory_space<vmem>>, vector<64x8xf32>
    tpu.vector_store %arg9[%c0_20, %c0_21], %20 {strides = array<i32>} : memref<64x8xf32, #tpu.memory_space<vmem>>, vector<64x8xf32>,
    return
  }
  func.func @transform_0(%arg0: i32) -> (i32, i32) {
    %c0_i32 = arith.constant 0 : i32
    %c0_i32_0 = arith.constant 0 : i32
    return %arg0, %c0_i32 : i32, i32
  }
  func.func @transform_1(%arg0: i32) -> (i32, i32) {
    %c0_i32 = arith.constant 0 : i32
    %c0_i32_0 = arith.constant 0 : i32
    return %arg0, %c0_i32 : i32, i32
  }
  func.func @transform_2(%arg0: i32) -> (i32, i32) {
    %c0_i32 = arith.constant 0 : i32
    %c0_i32_0 = arith.constant 0 : i32
    %c0_i32_1 = arith.constant 0 : i32
    return %c0_i32, %c0_i32_0 : i32, i32
  }
  func.func @transform_3(%arg0: i32) -> (i32, i32) {
    %c0_i32 = arith.constant 0 : i32
    %c0_i32_0 = arith.constant 0 : i32
    %c0_i32_1 = arith.constant 0 : i32
    return %c0_i32, %c0_i32_0 : i32, i32
  }
  func.func @transform_4(%arg0: i32) -> (i32, i32) {
    %c0_i32 = arith.constant 0 : i32
    %c0_i32_0 = arith.constant 0 : i32
    %c0_i32_1 = arith.constant 0 : i32
    return %c0_i32, %c0_i32_0 : i32, i32
  }
  func.func @transform_5(%arg0: i32) -> (i32, i32) {
    %c0_i32 = arith.constant 0 : i32
    %c0_i32_0 = arith.constant 0 : i32
    %c0_i32_1 = arith.constant 0 : i32
    return %c0_i32, %c0_i32_0 : i32, i32
  }
  func.func @transform_6(%arg0: i32) -> (i32, i32) {
    %c0_i32 = arith.constant 0 : i32
    %c0_i32_0 = arith.constant 0 : i32
    %c0_i32_1 = arith.constant 0 : i32
    return %c0_i32, %c0_i32_0 : i32, i32
  }
  func.func @transform_7(%arg0: i32) -> (i32, i32) {
    %c0_i32 = arith.constant 0 : i32
    %c0_i32_0 = arith.constant 0 : i32
    %c0_i32_1 = arith.constant 0 : i32
    return %c0_i32, %c0_i32_0 : i32, i32
  }
  func.func @transform_8(%arg0: i32) -> (i32, i32) {
    %c0_i32 = arith.constant 0 : i32
    %c0_i32_0 = arith.constant 0 : i32
    return %arg0, %c0_i32 : i32, i32
  }
  func.func @transform_9(%arg0: i32) -> (i32, i32) {
    %c0_i32 = arith.constant 0 : i32
    %c0_i32_0 = arith.constant 0 : i32
    return %arg0, %c0_i32 : i32, i32
  }
}

module attributes {stable_mosaic.version = 11 : i64} {
  func.func @_dense_synth_kernel(%arg0: i32, %arg1: memref<64x8xbf16, #tpu.memory_space<vmem>>, %arg2: memref<16x32xbf16, #tpu.memory_space<vmem>>, %arg3: memref<8x8xbf16, #tpu.memory_space<vmem>>, %arg4: memref<1x8xf32, #tpu.memory_space<vmem>>, %arg5: memref<8x8xbf16, #tpu.memory_space<vmem>>, %arg6: memref<1x8xf32, #tpu.memory_space<vmem>>, %arg7: memref<32x32xbf16, #tpu.memory_space<vmem>>, %arg8: memref<1x32xf32, #tpu.memory_space<vmem>>, %arg9: memref<64x8xf32, #tpu.memory_space<vmem>>, %arg10: memref<16x32xf32, #tpu.memory_space<vmem>>) attributes {dimension_semantics = [#tpu.dimension_semantics<parallel>], iteration_bounds = array<i64: 1>, scalar_prefetch = 0 : i64, scratch_operands = 0 : i64, tpu.core_type = #tpu.core_type<tc>, window_params = [{transform_indices = @transform_0, window_bounds = array<i64: 64, 8>}, {transform_indices = @transform_1, window_bounds = array<i64: 16, 32>}, {pipeline_mode = #tpu.pipeline_mode<synchronous>, transform_indices = @transform_2, window_bounds = array<i64: 8, 8>}, {pipeline_mode = #tpu.pipeline_mode<synchronous>, transform_indices = @transform_3, window_bounds = array<i64: 1, 8>}, {pipeline_mode = #tpu.pipeline_mode<synchronous>, transform_indices = @transform_4, window_bounds = array<i64: 8, 8>}, {pipeline_mode = #tpu.pipeline_mode<synchronous>, transform_indices = @transform_5, window_bounds = array<i64: 1, 8>}, {pipeline_mode = #tpu.pipeline_mode<synchronous>, transform_indices = @transform_6, window_bounds = array<i64: 32, 32>}, {pipeline_mode = #tpu.pipeline_mode<synchronous>, transform_indices = @transform_7, window_bounds = array<i64: 1, 32>}, {transform_indices = @transform_8, window_bounds = array<i64: 64, 8>}, {transform_indices = @transform_9, window_bounds = array<i64: 16, 32>}]} {
    %c0 = arith.constant 0 : index
    %c0_0 = arith.constant 0 : index
    %0 = vector.load %arg2[%c0, %c0_0] : memref<16x32xbf16, #tpu.memory_space<vmem>>, vector<16x32xbf16>
    %c0_1 = arith.constant 0 : index
    %c0_2 = arith.constant 0 : index
    %1 = vector.load %arg7[%c0_1, %c0_2] : memref<32x32xbf16, #tpu.memory_space<vmem>>, vector<32x32xbf16>
    %cst = arith.constant dense<0.000000e+00> : vector<16x32xf32>
    %2 = tpu.matmul %0, %1, %cst {dimension_numbers = #tpu.dot_dimension_numbers<[1], [0], [0], [1], [0, 0, 1, 1], [], []>} : vector<16x32xbf16>, vector<32x32xbf16>, vector<16x32xf32> -> vector<16x32xf32>
    %c0_3 = arith.constant 0 : index
    %c0_4 = arith.constant 0 : index
    %3 = vector.load %arg8[%c0_3, %c0_4] : memref<1x32xf32, #tpu.memory_space<vmem>>, vector<1x32xf32>
    %4 = vector.broadcast %3 : vector<1x32xf32> to vector<16x32xf32>
    %5 = arith.addf %2, %4 : vector<16x32xf32>
    %c0_5 = arith.constant 0 : index
    %c0_6 = arith.constant 0 : index
    %6 = vector.load %arg10[%c0_5, %c0_6] : memref<16x32xf32, #tpu.memory_space<vmem>>, vector<16x32xf32>
    tpu.vector_store %arg10[%c0_5, %c0_6], %5 {strides = array<i32>} : memref<16x32xf32, #tpu.memory_space<vmem>>, vector<16x32xf32>,
    %c0_7 = arith.constant 0 : index
    %c0_8 = arith.constant 0 : index
    %7 = vector.load %arg1[%c0_7, %c0_8] : memref<64x8xbf16, #tpu.memory_space<vmem>>, vector<64x8xbf16>
    %c0_9 = arith.constant 0 : index
    %c0_10 = arith.constant 0 : index
    %8 = vector.load %arg3[%c0_9, %c0_10] : memref<8x8xbf16, #tpu.memory_space<vmem>>, vector<8x8xbf16>
    %cst_11 = arith.constant dense<0.000000e+00> : vector<64x8xf32>
    %9 = tpu.matmul %7, %8, %cst_11 {dimension_numbers = #tpu.dot_dimension_numbers<[1], [0], [0], [1], [0, 0, 1, 1], [], []>} : vector<64x8xbf16>, vector<8x8xbf16>, vector<64x8xf32> -> vector<64x8xf32>
    %c0_12 = arith.constant 0 : index
    %c0_13 = arith.constant 0 : index
    %10 = vector.load %arg4[%c0_12, %c0_13] : memref<1x8xf32, #tpu.memory_space<vmem>>, vector<1x8xf32>
    %11 = vector.broadcast %10 : vector<1x8xf32> to vector<64x8xf32>
    %12 = arith.addf %9, %11 : vector<64x8xf32>
    %cst_14 = arith.constant 0.000000e+00 : f32
    %13 = vector.broadcast %cst_14 : f32 to vector<64x8xf32>
    %14 = arith.maximumf %12, %13 : vector<64x8xf32>
    %15 = arith.truncf %14 : vector<64x8xf32> to vector<64x8xbf16>
    %c0_15 = arith.constant 0 : index
    %c0_16 = arith.constant 0 : index
    %16 = vector.load %arg5[%c0_15, %c0_16] : memref<8x8xbf16, #tpu.memory_space<vmem>>, vector<8x8xbf16>
    %cst_17 = arith.constant dense<0.000000e+00> : vector<64x8xf32>
    %17 = tpu.matmul %15, %16, %cst_17 {dimension_numbers = #tpu.dot_dimension_numbers<[1], [0], [0], [1], [0, 0, 1, 1], [], []>} : vector<64x8xbf16>, vector<8x8xbf16>, vector<64x8xf32> -> vector<64x8xf32>
    %c0_18 = arith.constant 0 : index
    %c0_19 = arith.constant 0 : index
    %18 = vector.load %arg6[%c0_18, %c0_19] : memref<1x8xf32, #tpu.memory_space<vmem>>, vector<1x8xf32>
    %19 = vector.broadcast %18 : vector<1x8xf32> to vector<64x8xf32>
    %20 = arith.addf %17, %19 : vector<64x8xf32>
    %c0_20 = arith.constant 0 : index
    %c0_21 = arith.constant 0 : index
    %21 = vector.load %arg9[%c0_20, %c0_21] : memref<64x8xf32, #tpu.memory_space<vmem>>, vector<64x8xf32>
    tpu.vector_store %arg9[%c0_20, %c0_21], %20 {strides = array<i32>} : memref<64x8xf32, #tpu.memory_space<vmem>>, vector<64x8xf32>,
    return
  }
  func.func @transform_0(%arg0: i32) -> (i32, i32) {
    %c0_i32 = arith.constant 0 : i32
    %c0_i32_0 = arith.constant 0 : i32
    return %arg0, %c0_i32 : i32, i32
  }
  func.func @transform_1(%arg0: i32) -> (i32, i32) {
    %c0_i32 = arith.constant 0 : i32
    %c0_i32_0 = arith.constant 0 : i32
    return %arg0, %c0_i32 : i32, i32
  }
  func.func @transform_2(%arg0: i32) -> (i32, i32) {
    %c0_i32 = arith.constant 0 : i32
    %c0_i32_0 = arith.constant 0 : i32
    %c0_i32_1 = arith.constant 0 : i32
    return %c0_i32, %c0_i32_0 : i32, i32
  }
  func.func @transform_3(%arg0: i32) -> (i32, i32) {
    %c0_i32 = arith.constant 0 : i32
    %c0_i32_0 = arith.constant 0 : i32
    %c0_i32_1 = arith.constant 0 : i32
    return %c0_i32, %c0_i32_0 : i32, i32
  }
  func.func @transform_4(%arg0: i32) -> (i32, i32) {
    %c0_i32 = arith.constant 0 : i32
    %c0_i32_0 = arith.constant 0 : i32
    %c0_i32_1 = arith.constant 0 : i32
    return %c0_i32, %c0_i32_0 : i32, i32
  }
  func.func @transform_5(%arg0: i32) -> (i32, i32) {
    %c0_i32 = arith.constant 0 : i32
    %c0_i32_0 = arith.constant 0 : i32
    %c0_i32_1 = arith.constant 0 : i32
    return %c0_i32, %c0_i32_0 : i32, i32
  }
  func.func @transform_6(%arg0: i32) -> (i32, i32) {
    %c0_i32 = arith.constant 0 : i32
    %c0_i32_0 = arith.constant 0 : i32
    %c0_i32_1 = arith.constant 0 : i32
    return %c0_i32, %c0_i32_0 : i32, i32
  }
  func.func @transform_7(%arg0: i32) -> (i32, i32) {
    %c0_i32 = arith.constant 0 : i32
    %c0_i32_0 = arith.constant 0 : i32
    %c0_i32_1 = arith.constant 0 : i32
    return %c0_i32, %c0_i32_0 : i32, i32
  }
  func.func @transform_8(%arg0: i32) -> (i32, i32) {
    %c0_i32 = arith.constant 0 : i32
    %c0_i32_0 = arith.constant 0 : i32
    return %arg0, %c0_i32 : i32, i32
  }
  func.func @transform_9(%arg0: i32) -> (i32, i32) {
    %c0_i32 = arith.constant 0 : i32
    %c0_i32_0 = arith.constant 0 : i32
    return %arg0, %c0_i32 : i32, i32
  }
}

</mosaic_0001>

<bundles_post_ra>
// kernel: tpu_custom_call.1
= control target key start
LH: loop header
LB: loop body
LE: loop exit
PB: predicated region body
PF: predicated region fallthrough
CT: control target
= control target key end

     0   :  { %vm159_vm0 = vcmask 1043456   ;;  %vm146_vm1 = vcmask 64512   ;;  %v457_v5 = vmov 0.0   ;;  %s608_s0 = inlined_call_operand.vmem [shape: bf16[64,8], index: 0, kind: input, shape index: {}]   ;;  %s609_s1 = inlined_call_operand.vmem [shape: bf16[16,32], index: 1, kind: input, shape index: {}]   ;;  %s610_s2 = inlined_call_operand.vmem [shape: bf16[8,8], index: 2, kind: input, shape index: {}]   ;;  %s611_s3 = inlined_call_operand.vmem [shape: f32[1,8], index: 3, kind: input, shape index: {}]   ;;  %s612_s4 = inlined_call_operand.vmem [shape: bf16[8,8], index: 4, kind: input, shape index: {}]   ;;  %s613_s5 = inlined_call_operand.vmem [shape: f32[1,8], index: 5, kind: input, shape index: {}]   ;;  %s614_s6 = inlined_call_operand.vmem [shape: bf16[32,32], index: 6, kind: input, shape index: {}]   ;;  %s615_s7 = inlined_call_operand.vmem [shape: f32[1,32], index: 7, kind: input, shape index: {}]   ;;  %s616_s8 = inlined_call_operand.vmem [shape: f32[64,8], index: 8, kind: output, shape index: {0}]   ;;  %s617_s9 = inlined_call_operand.hbm [shape: f32[16,32], index: 9, kind: output, shape index: {1}]  }
   0x1   :  { %v118_v0 = vld [vmem:[%s610_s2] sm:$0xf]  ;;  %v427_v3 = vld [vmem:[%s608_s0 + $0x8] sm:$0xff]   ;;  %v428_v4 = vld [vmem:[%s608_s0 + $0x10] sm:$0xff]   ;;  %388 = vmatprep.subr.bf16.mxu0 %v457_v5 }
   0x2   :  { %v426_v1 = vld [vmem:[%s608_s0] sm:$0xff]   ;;  %418 = vmatprep.subr.msk.bf16.mxu1 %vm159_vm0, %v118_v0  ;;  %v161_v2 = vsel %vm159_vm0, %v118_v0, 0  ;;  %v431_v7 = vld [vmem:[%s614_s6 + $0x8] sm:$0xff]  }
   0x3   :  { %397 = vmatpush3.bf16.msra.mxu1 %v161_v2  ;;  %398 = vmatprep.mubr.msk.bf16.mxu1 %vm146_vm1, %v426_v1  ;;  %v430_v6 = vld [vmem:[%s614_s6] sm:$0xff]  }
   0x4   :  { %389 = vmatpush3.bf16.msra.mxu0 %v430_v6 }
   0x6   :  { %399 = vmatmul.mubr.msk.bf16.vlgmr.msra.gmra.mrb[0].mxu1 %vm146_vm1, %v427_v3 }
   0x7   :  { %402 = vmatprep.mubr.msk.bf16.mxu1 %vm146_vm1, %v428_v4 }
   0x8   :  { %15 = vsyncpa [#allocation3], 0  ;;  %390 = vmatprep.subr.bf16.mxu0 %v457_v5  ;;  %v429_v8 = vld [vmem:[%s608_s0 + $0x18] sm:$0xff]   ;;  %v432_v9 = vld [vmem:[%s609_s1] sm:$0xff]   ;;  %vm458_vm2 = vmmov 0   ;;  %vm63_vm3 = vcmask 261120  }
   0x9   :  { %391 = vmatpush3.bf16.msra.mxu0 %v431_v7  ;;  %392 = vmatprep.mubr.msk.bf16.mxu0 %vm458_vm2, %v457_v5  ;;  %v240_v10 = vld [vmem:[%s612_s4] sm:$0xf]  ;;  %s459_s4 = smov [#allocation2]  }
   0xa   :  { %420 = vmatprep.subr.msk.bf16.mxu1 %vm159_vm0, %v240_v10  ;;  %v261_v11 = vsel %vm159_vm0, %v240_v10, 0  ;;  %419 = vmatprep.subr.msk.bf16.mxu0 %vm159_vm0, %v240_v10  ;;  %v361_v12 = vld [vmem:[%s611_s3] ss:$0 sm:$0xff]  ;;  %s343_s26 = sshll.u32 %s459_s4, 4  ;;  %s344_s26 = int_to_ptr.vmem [resolvable:$true] %s343_s26 }
   0xb   :  { %417 = vmatpush3.bf16.msra.mxu1 %v261_v11  ;;  %v356_v41 = vld [vmem:[%s615_s7] ss:$0 sm:$0xff]  ;;  %s433_s27 = scalar_lea.vmem %s344_s26, 256  ;;  %p438_p1 = scmp.lt.s32.totalorder %s344_s26, %s344_s26 }
   0xc   :  { %393 = vmatmul.mubr.msk.bf16.vlgmr.msra.gmra.mrb[0].mxu0 %vm63_vm3, %v432_v9  ;;  %p434_p0 = scmp.ne.s32.totalorder %s344_s26, %s433_s27  ;;  %p439_p2 = scmp.lt.s32.totalorder %s433_s27, %s433_s27 }
   0xd   :  { %407 = vmatpush3.bf16.msra.mxu0 %v261_v11 }
   0xe   :  { %403 = vmatmul.mubr.msk.bf16.gmra.mrb[4].mxu1 %vm146_vm1, %v429_v8  ;;  %p440_p3 = por %p439_p2, %p438_p1 }
  0x10   :  { %p441_p4 = pnand %p440_p3, %p434_p0 }
  0xd9   :  { %v400_v13 = vpop.f32.mrb[0].mxu1 }
  0xda   :  { %v206_v14 = vadd.f32 %v400_v13, %v361_v12  ;;  %v197_v15 = vpop.f32.mrb[1].mxu1 }
  0xdb   :  { %v198_v16 = vadd.f32 %v361_v12, %v197_v15  ;;  %v401_v17 = vpop.f32.mrb[2].mxu1 }
  0xdc   :  { %v209_v18 = vadd.f32 %v401_v17, %v361_v12  ;;  %v200_v19 = vpop.f32.mrb[3].mxu1  ;;  %v230_v21 = vmax.f32 %v206_v14, 0.0 }
  0xdd   :  { %v201_v20 = vadd.f32 %v361_v12, %v200_v19  ;;  %v228_v23 = vmax.f32 %v198_v16, 0.0 }
  0xde   :  { %v231_v22 = vmax.f32 %v209_v18, 0.0 }
  0xdf   :  { %v229_v24 = vmax.f32 %v201_v20, 0.0  ;;  %v101_v42 = vpop.f32.mrb[0].mxu0 }
  0xe0   :  { %v237_v25 = vpack.c.bf16 %v231_v22, %v230_v21  ;;  %v102_v43 = vadd.f32 %v356_v41, %v101_v42  ;;  %v394_v44 = vpop.f32.mrb[1].mxu0 }
  0xe1   :  { %v236_v26 = vpack.c.bf16 %v229_v24, %v228_v23  ;;  %v404_v27 = vpop.f32.mrb[4].mxu1  ;;  %v104_v45 = vpop.f32.mrb[2].mxu0 }
  0xe2   :  { %v222_v28 = vadd.f32 %v404_v27, %v361_v12  ;;  %v213_v29 = vpop.f32.mrb[5].mxu1  ;;  %108 = vst.msk [vmem:[#allocation2] sm:$0xff] %vm63_vm3, %v102_v43  ;;  %v105_v46 = vadd.f32 %v356_v41, %v104_v45  ;;  %v395_v47 = vpop.f32.mrb[3].mxu0 }
  0xe3   :  { %v214_v30 = vadd.f32 %v361_v12, %v213_v29  ;;  %v405_v31 = vpop.f32.mrb[6].mxu1  ;;  %408 = vmatprep.mubr.msk.bf16.mxu0 %vm146_vm1, %v236_v26 }
  0xe4   :  { %v225_v32 = vadd.f32 %v405_v31, %v361_v12  ;;  %v216_v33 = vpop.f32.mrb[7].mxu1  ;;  %409 = vmatmul.mubr.msk.bf16.vlgmr.msra.gmra.mrb[4].mxu0 %vm146_vm1, %v237_v25  ;;  %v234_v35 = vmax.f32 %v222_v28, 0.0  ;;  %109 = vst.msk [vmem:[#allocation2 + $0x8] sm:$0xff] %vm63_vm3, %v105_v46 }
  0xe5   :  { %v217_v34 = vadd.f32 %v361_v12, %v216_v33  ;;  %v232_v37 = vmax.f32 %v214_v30, 0.0 }
  0xe6   :  { %v235_v36 = vmax.f32 %v225_v32, 0.0 }
  0xe7   :  { %v233_v38 = vmax.f32 %v217_v34, 0.0 }
  0xe8   :  { %v239_v39 = vpack.c.bf16 %v235_v36, %v234_v35 }
  0xe9   :  { %v238_v40 = vpack.c.bf16 %v233_v38, %v232_v37 }
  0xeb   :  { %412 = vmatprep.mubr.msk.bf16.mxu1 %vm146_vm1, %v238_v40 }
  0xec   :  { %413 = vmatmul.mubr.msk.bf16.vlgmr.msra.gmra.mrb[8].mxu1 %vm146_vm1, %v239_v39 }
  0xed   :  { %444 = shalt.err (!%p441_p4)
}
  0xee   :  { %s445_s29 = scalar_lea.hbm %s617_s9, 256 }
  0xef   :  { %p446_p5 = scmp.ne.s32.totalorder %s617_s9, %s445_s29  ;;  %p449_p6 = scmp.lt.u32.totalorder %s445_s29, %s617_s9 }
  0xf1   :  { %p451_p7 = pnand %p449_p6, %p446_p5 }
  0xf3   :  { %454 = shalt.err (!%p451_p7)
}
  0xf4   :  { %s460_s13 = smov 128   ;;  %s461_s14 = smov 8   ;;  %v370_v48 = vld [vmem:[%s613_s5] ss:$0 sm:$0xff] }
  0xf5   :  { %349 = dma.vmem_to_hbm [thread:$0]  %s344_s26, 256, %s617_s9, [#allocation3], %s460_s13, %s460_s13, %s461_s14  }
 0x1b7   :  { %v410_v49 = vpop.f32.mrb[4].mxu0 }
 0x1b8   :  { %v306_v50 = vadd.f32 %v410_v49, %v370_v48  ;;  %v297_v51 = vpop.f32.mrb[5].mxu0 }
 0x1b9   :  { %v298_v52 = vadd.f32 %v370_v48, %v297_v51  ;;  %v411_v53 = vpop.f32.mrb[6].mxu0 }
 0x1ba   :  { %330 = vst.msk [vmem:[%s616_s8 + $0x10] sm:$0xff] %vm146_vm1, %v306_v50  ;;  %v309_v54 = vadd.f32 %v411_v53, %v370_v48  ;;  %v300_v55 = vpop.f32.mrb[7].mxu0 }
 0x1bb   :  { %328 = vst.msk [vmem:[%s616_s8] sm:$0xff] %vm146_vm1, %v298_v52  ;;  %v301_v56 = vadd.f32 %v370_v48, %v300_v55 }
 0x1bc   :  { %331 = vst.msk [vmem:[%s616_s8 + $0x18] sm:$0xff] %vm146_vm1, %v309_v54 }
 0x1bd   :  { %329 = vst.msk [vmem:[%s616_s8 + $0x8] sm:$0xff] %vm146_vm1, %v301_v56 }
 0x1bf   :  { %v414_v57 = vpop.f32.mrb[8].mxu1 }
 0x1c0   :  { %v322_v58 = vadd.f32 %v414_v57, %v370_v48  ;;  %v313_v59 = vpop.f32.mrb[9].mxu1 }
 0x1c1   :  { %v314_v60 = vadd.f32 %v370_v48, %v313_v59  ;;  %v415_v61 = vpop.f32.mrb[10].mxu1 }
 0x1c2   :  { %334 = vst.msk [vmem:[%s616_s8 + $0x30] sm:$0xff] %vm146_vm1, %v322_v58  ;;  %v325_v62 = vadd.f32 %v415_v61, %v370_v48  ;;  %v316_v63 = vpop.f32.mrb[11].mxu1 }
 0x1c3   :  { %332 = vst.msk [vmem:[%s616_s8 + $0x20] sm:$0xff] %vm146_vm1, %v314_v60  ;;  %v317_v0 = vadd.f32 %v370_v48, %v316_v63 }
 0x1c4   :  { %335 = vst.msk [vmem:[%s616_s8 + $0x38] sm:$0xff] %vm146_vm1, %v325_v62 }
 0x1c5   :  { %333 = vst.msk [vmem:[%s616_s8 + $0x28] sm:$0xff] %vm146_vm1, %v317_v0 }
 0x1c6   :  { %455 = dma.done.wait [#allocation3], 256  }
 0x1c7   :  { %456 = vsyncadd [#allocation3], 4294967040 }
 0x1c8   :  { %355 = vsyncpa [#allocation3], 1 }

// kernel: tpu_custom_call.1
= control target key start
LH: loop header
LB: loop body
LE: loop exit
PB: predicated region body
PF: predicated region fallthrough
CT: control target
= control target key end

     0   :  { %vm159_vm0 = vcmask 1043456   ;;  %vm146_vm1 = vcmask 64512   ;;  %v457_v5 = vmov 0.0   ;;  %s608_s0 = inlined_call_operand.vmem [shape: bf16[64,8], index: 0, kind: input, shape index: {}]   ;;  %s609_s1 = inlined_call_operand.vmem [shape: bf16[16,32], index: 1, kind: input, shape index: {}]   ;;  %s610_s2 = inlined_call_operand.vmem [shape: bf16[8,8], index: 2, kind: input, shape index: {}]   ;;  %s611_s3 = inlined_call_operand.vmem [shape: f32[1,8], index: 3, kind: input, shape index: {}]   ;;  %s612_s4 = inlined_call_operand.vmem [shape: bf16[8,8], index: 4, kind: input, shape index: {}]   ;;  %s613_s5 = inlined_call_operand.vmem [shape: f32[1,8], index: 5, kind: input, shape index: {}]   ;;  %s614_s6 = inlined_call_operand.vmem [shape: bf16[32,32], index: 6, kind: input, shape index: {}]   ;;  %s615_s7 = inlined_call_operand.vmem [shape: f32[1,32], index: 7, kind: input, shape index: {}]   ;;  %s616_s8 = inlined_call_operand.vmem [shape: f32[64,8], index: 8, kind: output, shape index: {0}]   ;;  %s617_s9 = inlined_call_operand.hbm [shape: f32[16,32], index: 9, kind: output, shape index: {1}]  }
   0x1   :  { %v118_v0 = vld [vmem:[%s610_s2] sm:$0xf]  ;;  %v427_v3 = vld [vmem:[%s608_s0 + $0x8] sm:$0xff]   ;;  %v428_v4 = vld [vmem:[%s608_s0 + $0x10] sm:$0xff]   ;;  %388 = vmatprep.subr.bf16.mxu0 %v457_v5 }
   0x2   :  { %v426_v1 = vld [vmem:[%s608_s0] sm:$0xff]   ;;  %418 = vmatprep.subr.msk.bf16.mxu1 %vm159_vm0, %v118_v0  ;;  %v161_v2 = vsel %vm159_vm0, %v118_v0, 0  ;;  %v431_v7 = vld [vmem:[%s614_s6 + $0x8] sm:$0xff]  }
   0x3   :  { %397 = vmatpush3.bf16.msra.mxu1 %v161_v2  ;;  %398 = vmatprep.mubr.msk.bf16.mxu1 %vm146_vm1, %v426_v1  ;;  %v430_v6 = vld [vmem:[%s614_s6] sm:$0xff]  }
   0x4   :  { %389 = vmatpush3.bf16.msra.mxu0 %v430_v6 }
   0x6   :  { %399 = vmatmul.mubr.msk.bf16.vlgmr.msra.gmra.mrb[0].mxu1 %vm146_vm1, %v427_v3 }
   0x7   :  { %402 = vmatprep.mubr.msk.bf16.mxu1 %vm146_vm1, %v428_v4 }
   0x8   :  { %15 = vsyncpa [#allocation3], 0  ;;  %390 = vmatprep.subr.bf16.mxu0 %v457_v5  ;;  %v429_v8 = vld [vmem:[%s608_s0 + $0x18] sm:$0xff]   ;;  %v432_v9 = vld [vmem:[%s609_s1] sm:$0xff]   ;;  %vm458_vm2 = vmmov 0   ;;  %vm63_vm3 = vcmask 261120  }
   0x9   :  { %391 = vmatpush3.bf16.msra.mxu0 %v431_v7  ;;  %392 = vmatprep.mubr.msk.bf16.mxu0 %vm458_vm2, %v457_v5  ;;  %v240_v10 = vld [vmem:[%s612_s4] sm:$0xf]  ;;  %s459_s4 = smov [#allocation2]  }
   0xa   :  { %420 = vmatprep.subr.msk.bf16.mxu1 %vm159_vm0, %v240_v10  ;;  %v261_v11 = vsel %vm159_vm0, %v240_v10, 0  ;;  %419 = vmatprep.subr.msk.bf16.mxu0 %vm159_vm0, %v240_v10  ;;  %v361_v12 = vld [vmem:[%s611_s3] ss:$0 sm:$0xff]  ;;  %s343_s26 = sshll.u32 %s459_s4, 4  ;;  %s344_s26 = int_to_ptr.vmem [resolvable:$true] %s343_s26 }
   0xb   :  { %417 = vmatpush3.bf16.msra.mxu1 %v261_v11  ;;  %v356_v41 = vld [vmem:[%s615_s7] ss:$0 sm:$0xff]  ;;  %s433_s27 = scalar_lea.vmem %s344_s26, 256  ;;  %p438_p1 = scmp.lt.s32.totalorder %s344_s26, %s344_s26 }
   0xc   :  { %393 = vmatmul.mubr.msk.bf16.vlgmr.msra.gmra.mrb[0].mxu0 %vm63_vm3, %v432_v9  ;;  %p434_p0 = scmp.ne.s32.totalorder %s344_s26, %s433_s27  ;;  %p439_p2 = scmp.lt.s32.totalorder %s433_s27, %s433_s27 }
   0xd   :  { %407 = vmatpush3.bf16.msra.mxu0 %v261_v11 }
   0xe   :  { %403 = vmatmul.mubr.msk.bf16.gmra.mrb[4].mxu1 %vm146_vm1, %v429_v8  ;;  %p440_p3 = por %p439_p2, %p438_p1 }
  0x10   :  { %p441_p4 = pnand %p440_p3, %p434_p0 }
  0xd9   :  { %v400_v13 = vpop.f32.mrb[0].mxu1 }
  0xda   :  { %v206_v14 = vadd.f32 %v400_v13, %v361_v12  ;;  %v197_v15 = vpop.f32.mrb[1].mxu1 }
  0xdb   :  { %v198_v16 = vadd.f32 %v361_v12, %v197_v15  ;;  %v401_v17 = vpop.f32.mrb[2].mxu1 }
  0xdc   :  { %v209_v18 = vadd.f32 %v401_v17, %v361_v12  ;;  %v200_v19 = vpop.f32.mrb[3].mxu1  ;;  %v230_v21 = vmax.f32 %v206_v14, 0.0 }
  0xdd   :  { %v201_v20 = vadd.f32 %v361_v12, %v200_v19  ;;  %v228_v23 = vmax.f32 %v198_v16, 0.0 }
  0xde   :  { %v231_v22 = vmax.f32 %v209_v18, 0.0 }
  0xdf   :  { %v229_v24 = vmax.f32 %v201_v20, 0.0  ;;  %v101_v42 = vpop.f32.mrb[0].mxu0 }
  0xe0   :  { %v237_v25 = vpack.c.bf16 %v231_v22, %v230_v21  ;;  %v102_v43 = vadd.f32 %v356_v41, %v101_v42  ;;  %v394_v44 = vpop.f32.mrb[1].mxu0 }
  0xe1   :  { %v236_v26 = vpack.c.bf16 %v229_v24, %v228_v23  ;;  %v404_v27 = vpop.f32.mrb[4].mxu1  ;;  %v104_v45 = vpop.f32.mrb[2].mxu0 }
  0xe2   :  { %v222_v28 = vadd.f32 %v404_v27, %v361_v12  ;;  %v213_v29 = vpop.f32.mrb[5].mxu1  ;;  %108 = vst.msk [vmem:[#allocation2] sm:$0xff] %vm63_vm3, %v102_v43  ;;  %v105_v46 = vadd.f32 %v356_v41, %v104_v45  ;;  %v395_v47 = vpop.f32.mrb[3].mxu0 }
  0xe3   :  { %v214_v30 = vadd.f32 %v361_v12, %v213_v29  ;;  %v405_v31 = vpop.f32.mrb[6].mxu1  ;;  %408 = vmatprep.mubr.msk.bf16.mxu0 %vm146_vm1, %v236_v26 }
  0xe4   :  { %v225_v32 = vadd.f32 %v405_v31, %v361_v12  ;;  %v216_v33 = vpop.f32.mrb[7].mxu1  ;;  %409 = vmatmul.mubr.msk.bf16.vlgmr.msra.gmra.mrb[4].mxu0 %vm146_vm1, %v237_v25  ;;  %v234_v35 = vmax.f32 %v222_v28, 0.0  ;;  %109 = vst.msk [vmem:[#allocation2 + $0x8] sm:$0xff] %vm63_vm3, %v105_v46 }
  0xe5   :  { %v217_v34 = vadd.f32 %v361_v12, %v216_v33  ;;  %v232_v37 = vmax.f32 %v214_v30, 0.0 }
  0xe6   :  { %v235_v36 = vmax.f32 %v225_v32, 0.0 }
  0xe7   :  { %v233_v38 = vmax.f32 %v217_v34, 0.0 }
  0xe8   :  { %v239_v39 = vpack.c.bf16 %v235_v36, %v234_v35 }
  0xe9   :  { %v238_v40 = vpack.c.bf16 %v233_v38, %v232_v37 }
  0xeb   :  { %412 = vmatprep.mubr.msk.bf16.mxu1 %vm146_vm1, %v238_v40 }
  0xec   :  { %413 = vmatmul.mubr.msk.bf16.vlgmr.msra.gmra.mrb[8].mxu1 %vm146_vm1, %v239_v39 }
  0xed   :  { %444 = shalt.err (!%p441_p4)
}
  0xee   :  { %s445_s29 = scalar_lea.hbm %s617_s9, 256 }
  0xef   :  { %p446_p5 = scmp.ne.s32.totalorder %s617_s9, %s445_s29  ;;  %p449_p6 = scmp.lt.u32.totalorder %s445_s29, %s617_s9 }
  0xf1   :  { %p451_p7 = pnand %p449_p6, %p446_p5 }
  0xf3   :  { %454 = shalt.err (!%p451_p7)
}
  0xf4   :  { %s460_s13 = smov 128   ;;  %s461_s14 = smov 8   ;;  %v370_v48 = vld [vmem:[%s613_s5] ss:$0 sm:$0xff] }
  0xf5   :  { %349 = dma.vmem_to_hbm [thread:$0]  %s344_s26, 256, %s617_s9, [#allocation3], %s460_s13, %s460_s13, %s461_s14  }
 0x1b7   :  { %v410_v49 = vpop.f32.mrb[4].mxu0 }
 0x1b8   :  { %v306_v50 = vadd.f32 %v410_v49, %v370_v48  ;;  %v297_v51 = vpop.f32.mrb[5].mxu0 }
 0x1b9   :  { %v298_v52 = vadd.f32 %v370_v48, %v297_v51  ;;  %v411_v53 = vpop.f32.mrb[6].mxu0 }
 0x1ba   :  { %330 = vst.msk [vmem:[%s616_s8 + $0x10] sm:$0xff] %vm146_vm1, %v306_v50  ;;  %v309_v54 = vadd.f32 %v411_v53, %v370_v48  ;;  %v300_v55 = vpop.f32.mrb[7].mxu0 }
 0x1bb   :  { %328 = vst.msk [vmem:[%s616_s8] sm:$0xff] %vm146_vm1, %v298_v52  ;;  %v301_v56 = vadd.f32 %v370_v48, %v300_v55 }
 0x1bc   :  { %331 = vst.msk [vmem:[%s616_s8 + $0x18] sm:$0xff] %vm146_vm1, %v309_v54 }
 0x1bd   :  { %329 = vst.msk [vmem:[%s616_s8 + $0x8] sm:$0xff] %vm146_vm1, %v301_v56 }
 0x1bf   :  { %v414_v57 = vpop.f32.mrb[8].mxu1 }
 0x1c0   :  { %v322_v58 = vadd.f32 %v414_v57, %v370_v48  ;;  %v313_v59 = vpop.f32.mrb[9].mxu1 }
 0x1c1   :  { %v314_v60 = vadd.f32 %v370_v48, %v313_v59  ;;  %v415_v61 = vpop.f32.mrb[10].mxu1 }
 0x1c2   :  { %334 = vst.msk [vmem:[%s616_s8 + $0x30] sm:$0xff] %vm146_vm1, %v322_v58  ;;  %v325_v62 = vadd.f32 %v415_v61, %v370_v48  ;;  %v316_v63 = vpop.f32.mrb[11].mxu1 }
 0x1c3   :  { %332 = vst.msk [vmem:[%s616_s8 + $0x20] sm:$0xff] %vm146_vm1, %v314_v60  ;;  %v317_v0 = vadd.f32 %v370_v48, %v316_v63 }
 0x1c4   :  { %335 = vst.msk [vmem:[%s616_s8 + $0x38] sm:$0xff] %vm146_vm1, %v325_v62 }
 0x1c5   :  { %333 = vst.msk [vmem:[%s616_s8 + $0x28] sm:$0xff] %vm146_vm1, %v317_v0 }
 0x1c6   :  { %455 = dma.done.wait [#allocation3], 256  }
 0x1c7   :  { %456 = vsyncadd [#allocation3], 4294967040 }
 0x1c8   :  { %355 = vsyncpa [#allocation3], 1 }

</bundles_post_ra>
